<compile_context>
chip_gen: v6e
topology: v6e:2x2x1
jax: 0.10.0
libtpu: 0.0.40
codegen_flags: <defaults>
</compile_context>

<pallas_src>
import functools

import jax
import jax.numpy as jnp
from jax.experimental import pallas as pl
from jax.experimental.pallas import tpu as pltpu


_TARGET_TILE_BYTES = 8 * 1024 * 1024     # ~8 MiB x-tile; double-buffered -> 16 MiB
_MAX_LANE_GROUPS_PER_BLOCK = 64          # multi-HW fallback: <= 64*128 lanes/block
_VMEM_LIMIT_BYTES = 32 * 1024 * 1024


def _round_up(a, m):
    return ((a + m - 1) // m) * m


def _pow_pos(x, p, static_p):
    """x ** p for x > 0 (already clamped). Static p avoids the EUP entirely."""
    if static_p is None:
        return jnp.exp(p * jnp.log(x))            # traced exponent -> EUP path
    sp = float(static_p)
    if sp == round(sp) and 1 <= int(round(sp)) <= 16:
        n = int(round(sp))                         # square-and-multiply on VPU
        result, base = None, x
        while n:
            if n & 1:
                result = base if result is None else result * base
            n >>= 1
            if n:
                base = base * base
        return result
    return jnp.exp(jnp.float32(sp) * jnp.log(x))   # non-integer static p


def _root(mean, p, static_p):
    """mean ** (1/p); one value per pooling window -> negligible cost."""
    if static_p is None:
        return jnp.exp(jnp.log(mean) * (1.0 / p))
    sp = float(static_p)
    if sp == 1.0:
        return mean
    if sp == 2.0:
        return jnp.sqrt(mean)
    return jnp.exp(jnp.log(mean) * (1.0 / sp))


def _gem_kernel_single(*refs, eps, hw, g, static_p):
    """One lane block covers the whole reduction (the common GeM case)."""
    if static_p is None:
        p_ref, x_ref, o_ref = refs
        p = p_ref[0]
    else:
        x_ref, o_ref = refs
        p = None

    x = x_ref[...].astype(jnp.float32)             # (tb, g*hw)
    xc = jnp.maximum(x, eps)                       # clamp(min=eps) -> positive
    xp = _pow_pos(xc, p, static_p)

    if g == 1:
        s = jnp.sum(xp, axis=-1, keepdims=True)                        # (tb, 1)
    else:
        # Per-window sums via a block-ones matmul on the MXU: column j of the
        # selector is 1 over window j's hw contiguous lanes.
        ghw = g * hw
        r = jax.lax.broadcasted_iota(jnp.int32, (ghw, g), 0)
        c = jax.lax.broadcasted_iota(jnp.int32, (ghw, g), 1)
        lo = c * hw
        sel = jnp.logical_and(r >= lo, r < lo + hw).astype(jnp.float32)
        s = jnp.dot(xp, sel, preferred_element_type=jnp.float32)       # (tb, g)

    mean = s * (1.0 / hw)
    o_ref[...] = _root(mean, p, static_p).astype(o_ref.dtype)


def _gem_kernel_multi(*refs, eps, hw_total, thw, needs_mask, static_p):
    """Huge-H*W fallback: lane axis tiled, lane-wide f32 accumulator."""
    if static_p is None:
        p_ref, x_ref, o_ref, acc_ref = refs
        p = p_ref[0]
    else:
        x_ref, o_ref, acc_ref = refs
        p = None

    hj = pl.program_id(1)
    last = pl.num_programs(1) - 1

    @pl.when(hj == 0)
    def _init():
        acc_ref[...] = jnp.zeros_like(acc_ref)

    def accumulate(mask_tail):
        x = x_ref[...].astype(jnp.float32)         # (tb, thw), thw % 128 == 0
        xc = jnp.maximum(x, eps)
        xp = _pow_pos(xc, p, static_p)
        if mask_tail:
            # Ragged tail block: keep the select *after* the pow (a 0/1
            # multiply would give Inf*0=NaN for negative learned p).
            col = hj * thw + jax.lax.broadcasted_iota(jnp.int32, xp.shape, 1)
            xp = jnp.where(col < hw_total, xp, 0.0)
        # Fold thw//128 lane groups into a lane-wide (tb, 128) partial using
        # static, lane-aligned slices: pure VPU adds, no per-step XLU reduce,
        # no 1-live-lane accumulator traffic.
        partial = xp[:, 0:128]
        for grp in range(1, thw // 128):
            partial = partial + xp[:, grp * 128:(grp + 1) * 128]
        acc_ref[...] += partial

    if needs_mask:
        @pl.when(hj != last)
        def _body():
            accumulate(False)

        @pl.when(hj == last)
        def _tail():
            accumulate(True)
    else:
        accumulate(False)

    @pl.when(hj == last)
    def _finalize():
        total = jnp.sum(acc_ref[...], axis=-1, keepdims=True)   # one XLU reduce
        mean = total * (1.0 / hw_total)
        o_ref[...] = _root(mean, p, static_p).astype(o_ref.dtype)


def gem_pallas(x, p=None, eps=1e-6, static_p=None, max_block_lanes=None):
    """Generalized-mean pooling.  x: (N, C, H, W) -> (N, C, 1, 1).

    p        : (1,) learned exponent (traced); required if static_p is None.
    static_p : Python number; enables the transcendental-free VPU power path.
    bf16 x is supported (recommended on HBM-bound v5e); math runs in f32.
    """
    if static_p is None and p is None:
        raise ValueError("gem_pallas: provide either a traced `p` or `static_p`.")
    N, C, H, W = x.shape
    B, HW = N * C, H * W
    itemsize = jnp.dtype(x.dtype).itemsize

    # ---- pack g windows per row when HW < 128 (lane occupancy) -------------
    g = 1
    if HW < 128:
        for cand in range(min(128 // HW, B), 0, -1):
            if B % cand == 0:
                g = cand
                break
    R, Wd = B // g, g * HW
    x2 = x.reshape(R, Wd)                      # contiguous -> free view

    # ---- lane-axis blocking --------------------------------------------------
    lanes_cap = _TARGET_TILE_BYTES // (8 * itemsize)
    if max_block_lanes is not None:            # test hook / manual override
        lanes_cap = min(lanes_cap, int(max_block_lanes))
    lanes_cap = max(128, (lanes_cap // 128) * 128)
    single = Wd <= lanes_cap

    cost = pl.CostEstimate(
        flops=(5 if static_p is not None else 3) * B * HW,
        transcendentals=(2 * B if static_p is not None else 2 * B * HW + 2 * B),
        bytes_accessed=B * HW * itemsize + B * itemsize + 4,
    )

    in_specs = []
    args = []
    if static_p is None:
        in_specs.append(pl.BlockSpec(memory_space=pltpu.MemorySpace.SMEM))
        args.append(jnp.asarray(p, jnp.float32).reshape(1))

    def pick_tb(rows, row_bytes):
        max_tb = max(8, (_TARGET_TILE_BYTES // row_bytes) // 8 * 8)
        if rows <= 8:
            return rows
        # >= 2 steps on the parallel axis when possible (v7x megacore), within
        # the lane-padded VMEM byte budget.
        return min(max_tb, max(8, _round_up((rows + 1) // 2, 8)))

    if single:
        tb = pick_tb(R, _round_up(Wd, 128) * itemsize)   # lane-padded budget
        nb = pl.cdiv(R, tb)
        kernel = functools.partial(
            _gem_kernel_single, eps=float(eps), hw=HW, g=g, static_p=static_p)
        in_specs.append(pl.BlockSpec((tb, Wd), lambda i: (i, 0)))
        args.append(x2)
        out = pl.pallas_call(
            kernel,
            out_shape=jax.ShapeDtypeStruct((R, g), x.dtype),
            grid_spec=pltpu.PrefetchScalarGridSpec(
                num_scalar_prefetch=0,
                grid=(nb,),
                in_specs=in_specs,
                out_specs=pl.BlockSpec((tb, g), lambda i: (i, 0)),
            ),
            compiler_params=pltpu.CompilerParams(
                dimension_semantics=("parallel",),
                vmem_limit_bytes=_VMEM_LIMIT_BYTES,
            ),
            cost_estimate=cost,
        )(*args)
    else:
        # Huge H*W: tile the lane axis (g == 1 here since HW >= 128).
        thw = min(lanes_cap, _MAX_LANE_GROUPS_PER_BLOCK * 128)
        nhw = pl.cdiv(Wd, thw)
        needs_mask = (Wd % thw) != 0            # ragged tail block only
        tb = pick_tb(R, thw * itemsize)
        nb = pl.cdiv(R, tb)
        kernel = functools.partial(
            _gem_kernel_multi, eps=float(eps), hw_total=HW, thw=thw,
            needs_mask=needs_mask, static_p=static_p)
        in_specs.append(pl.BlockSpec((tb, thw), lambda i, j: (i, j)))
        args.append(x2)
        out = pl.pallas_call(
            kernel,
            out_shape=jax.ShapeDtypeStruct((R, 1), x.dtype),
            grid_spec=pltpu.PrefetchScalarGridSpec(
                num_scalar_prefetch=0,
                grid=(nb, nhw),
                in_specs=in_specs,
                out_specs=pl.BlockSpec((tb, 1), lambda i, j: (i, 0)),
                scratch_shapes=[pltpu.VMEM((tb, 128), jnp.float32)],
            ),
            compiler_params=pltpu.CompilerParams(
                dimension_semantics=("parallel", "arbitrary"),
                vmem_limit_bytes=_VMEM_LIMIT_BYTES,
            ),
            cost_estimate=cost,
        )(*args)

    return out.reshape(N, C, 1, 1)


if __name__ == "__main__":
    key = jax.random.PRNGKey(0)
    eps = 1e-6
    p = jnp.ones((1,), dtype=jnp.float32) * 3.0   # GeM.__init__: ones(1) * 3

    def gem_ref(x, pv, eps):
        xp = jnp.maximum(x.astype(jnp.float32), eps) ** pv
        return (jnp.mean(xp, axis=(2, 3), keepdims=True) ** (1.0 / pv)).astype(x.dtype)

    k1, k2, k3 = jax.random.split(key, 3)
    x1 = jax.random.normal(k1, (2, 4, 16, 16), dtype=jnp.float32)
    x2 = jax.random.normal(k2, (2, 4, 7, 7), dtype=jnp.float32)    # packed g=2
    x3 = jax.random.normal(k3, (2, 4, 30, 30), dtype=jnp.float32)  # forced multi

    checks = [
        # (got, want, atol, rtol)
        (gem_pallas(x1, p, eps=eps), gem_ref(x1, 3.0, eps), 2e-5, 1e-4),
        (gem_pallas(x1, eps=eps, static_p=3.0), gem_ref(x1, 3.0, eps), 2e-5, 1e-4),
        # Packed-window path uses the MXU; allow for reduced-precision passes.
        (gem_pallas(x2, p, eps=eps), gem_ref(x2, 3.0, eps), 1e-3, 2e-3),
        # Tiled-HW fallback with ragged, masked tail (traced and static p).
        (gem_pallas(x3, p, eps=eps, max_block_lanes=512),
         gem_ref(x3, 3.0, eps), 2e-5, 1e-4),
        (gem_pallas(x3, eps=eps, static_p=3.0, max_block_lanes=512),
         gem_ref(x3, 3.0, eps), 2e-5, 1e-4),
    ]

    for i, (got, want, atol, rtol) in enumerate(checks):
        got = jax.block_until_ready(got)
        assert got.shape == want.shape, (i, got.shape, want.shape)
        err = float(jnp.max(jnp.abs(got - want)))
        assert jnp.allclose(got, want, atol=atol, rtol=rtol), (i, err)

    print("KERNEL_OK")
</pallas_src>

<mosaic_0001>
module attributes {stable_mosaic.version = 11 : i64} {
  func.func @_gem_kernel_single(%arg0: i32, %arg1: memref<1xf32, #tpu.memory_space<smem>>, %arg2: memref<8x256xf32, #tpu.memory_space<vmem>>, %arg3: memref<8x1xf32, #tpu.memory_space<vmem>>) attributes {dimension_semantics = [#tpu.dimension_semantics<parallel>], iteration_bounds = array<i64: 1>, scalar_prefetch = 0 : i64, scratch_operands = 0 : i64, tpu.core_type = #tpu.core_type<tc>, window_params = [{transform_indices = @transform_0, window_bounds = array<i64: 1>}, {transform_indices = @transform_1, window_bounds = array<i64: 8, 256>}, {transform_indices = @transform_2, window_bounds = array<i64: 8, 1>}]} {
    %c0 = arith.constant 0 : index
    %0 = memref.load %arg1[%c0] : memref<1xf32, #tpu.memory_space<smem>>
    %c0_0 = arith.constant 0 : index
    %c0_1 = arith.constant 0 : index
    %1 = vector.load %arg2[%c0_0, %c0_1] : memref<8x256xf32, #tpu.memory_space<vmem>>, vector<8x256xf32>
    %cst = arith.constant 9.99999997E-7 : f32
    %2 = vector.broadcast %cst : f32 to vector<8x256xf32>
    %3 = arith.maximumf %1, %2 : vector<8x256xf32>
    %4 = math.log %3 : vector<8x256xf32>
    %5 = vector.broadcast %0 : f32 to vector<8x256xf32>
    %6 = arith.mulf %5, %4 : vector<8x256xf32>
    %7 = math.exp %6 : vector<8x256xf32>
    %cst_2 = arith.constant dense<0.000000e+00> : vector<8xf32>
    %8 = vector.multi_reduction <add>, %7, %cst_2 [1] : vector<8x256xf32> to vector<8xf32>
    %9 = vector.shape_cast %8 : vector<8xf32> to vector<8x1xf32>
    %cst_3 = arith.constant 3.906250e-03 : f32
    %10 = vector.broadcast %cst_3 : f32 to vector<8x1xf32>
    %11 = arith.mulf %9, %10 : vector<8x1xf32>
    %12 = math.log %11 : vector<8x1xf32>
    %cst_4 = arith.constant 1.000000e+00 : f32
    %13 = arith.divf %cst_4, %0 : f32
    %14 = vector.broadcast %13 : f32 to vector<8x1xf32>
    %15 = arith.mulf %12, %14 : vector<8x1xf32>
    %16 = math.exp %15 : vector<8x1xf32>
    %c0_5 = arith.constant 0 : index
    %c0_6 = arith.constant 0 : index
    %17 = vector.load %arg3[%c0_5, %c0_6] : memref<8x1xf32, #tpu.memory_space<vmem>>, vector<8x1xf32>
    tpu.vector_store %arg3[%c0_5, %c0_6], %16 {strides = array<i32>} : memref<8x1xf32, #tpu.memory_space<vmem>>, vector<8x1xf32>,
    return
  }
  func.func @transform_0(%arg0: i32) -> i32 {
    %c0_i32 = arith.constant 0 : i32
    %c0_i32_0 = arith.constant 0 : i32
    return %c0_i32 : i32
  }
  func.func @transform_1(%arg0: i32) -> (i32, i32) {
    %c0_i32 = arith.constant 0 : i32
    %c0_i32_0 = arith.constant 0 : i32
    return %arg0, %c0_i32 : i32, i32
  }
  func.func @transform_2(%arg0: i32) -> (i32, i32) {
    %c0_i32 = arith.constant 0 : i32
    %c0_i32_0 = arith.constant 0 : i32
    return %arg0, %c0_i32 : i32, i32
  }
}

</mosaic_0001>

<bundles_post_ra>
// kernel: tpu_custom_call.1
= control target key start
LH: loop header
LB: loop body
LE: loop exit
PB: predicated region body
PF: predicated region fallthrough
CT: control target
= control target key end

     0   :  { %8 = vsyncpa [#allocation4], 0  ;;  %s99_s9 = smov [#allocation3]   ;;  %s124_s0 = inlined_call_operand.<no memory space> [shape: f32[1], index: 0, kind: input, shape index: {}]   ;;  %s125_s1 = inlined_call_operand.hbm [shape: f32[8,256], index: 1, kind: input, shape index: {}]   ;;  %s126_s2 = inlined_call_operand.vmem [shape: f32[8,1], index: 2, kind: output, shape index: {}]  }
   0x1   :  { %s17_s10 = sshll.u32 %s99_s9, 4  ;;  %s18_s10 = int_to_ptr.vmem [resolvable:$true] %s17_s10 }
   0x2   :  { %s85_s11 = scalar_lea.vmem %s18_s10, 256  ;;  %p90_p1 = scmp.lt.s32.totalorder %s18_s10, %s18_s10 }
   0x3   :  { %p86_p0 = scmp.ne.s32.totalorder %s18_s10, %s85_s11  ;;  %p91_p2 = scmp.lt.s32.totalorder %s85_s11, %s85_s11 }
   0x5   :  { %p92_p3 = por %p91_p2, %p90_p1 }
   0x7   :  { %p93_p4 = pnand %p92_p3, %p86_p0 }
   0x9   :  { %96 = shalt.err (!%p93_p4)
}
   0xa   :  { %20 = dma.hbm_to_vmem [thread:$0]  %s125_s1, 256, %s18_s10, [#allocation4]  }
   0xb   :  { %97 = dma.done.wait [#allocation4], 256  }
   0xc   :  { %98 = vsyncadd [#allocation4], 4294967040  ;;  %v33_v0 = vstv %s124_s0  ;;  %v25_v1 = vld [vmem:[#allocation3] sm:$0xff]  ;;  %v26_v2 = vld [vmem:[#allocation3 + $0x8] sm:$0xff]  ;;  %vm53_vm0 = vcmask 7168  }
   0xd   :  { %63 = vrcp.f32 %v33_v0  ;;  %v27_v3 = vmax.f32 %v25_v1, 1e-06  ;;  %v28_v4 = vmax.f32 %v26_v2, 1e-06 }
   0xf   :  { %65 = vlog2.f32 %v27_v3 }
  0x10   :  { %67 = vlog2.f32 %v28_v4 }
  0x1a   :  { %v64_v5 = vpop.eup %63 }
  0x1b   :  { %60 = vpush %v64_v5 }
  0x1c   :  { %v66_v6 = vpop.eup %65 }
  0x1d   :  { %v68_v7 = vpop.eup %67  ;;  %v30_v8 = vmul.f32 0.6931472, %v66_v6 }
  0x1e   :  { %v32_v9 = vmul.f32 0.6931472, %v68_v7 }
  0x1f   :  { %v34_v10 = vmul.f32 %v33_v0, %v30_v8 }
  0x20   :  { %v35_v11 = vmul.f32 %v33_v0, %v32_v9 }
  0x21   :  { %v36_v12 = vmul.f32 1.442695, %v34_v10 }
  0x22   :  { %v38_v13 = vmul.f32 1.442695, %v35_v11 }
  0x23   :  { %69 = vpow2.f32 %v36_v12 }
  0x24   :  { %71 = vpow2.f32 %v38_v13 }
  0x30   :  { %v70_v14 = vpop.eup %69 }
  0x31   :  { %v72_v15 = vpop.eup %71 }
  0x32   :  { %v40_v16 = vadd.f32 %v72_v15, %v70_v14 }
  0x34   :  { %41 = vadd.xlane.f32.xlu0 %v40_v16 }
  0x4c   :  { %s61_s0 = spop %60 }
  0x4d   :  { %v49_v20 = vstv %s61_s0 }
  0xbd   :  { %v42_v17 = vpop.xlane.xlu0 %41 }
  0xbe   :  { %v43_v18 = vmul.f32 0.00390625, %v42_v17 }
  0xc0   :  { %73 = vlog2.f32 %v43_v18 }
  0xcd   :  { %v74_v19 = vpop.eup %73 }
  0xce   :  { %v45_v21 = vmul.f32 0.6931472, %v74_v19 }
  0xd0   :  { %v50_v22 = vmul.f32 %v49_v20, %v45_v21 }
  0xd2   :  { %v51_v23 = vmul.f32 1.442695, %v50_v22 }
  0xd4   :  { %75 = vpow2.f32 %v51_v23 }
  0xe1   :  { %v76_v24 = vpop.eup %75 }
  0xe2   :  { %54 = vst.msk [vmem:[%s126_s2] sm:$0xff] %vm53_vm0, %v76_v24 }
  0xe3   :  { %59 = vsyncpa [#allocation4], 1 }

</bundles_post_ra>
